<compile_context>
chip_gen: v6e
topology: v6e:2x2x1
jax: 0.10.0
libtpu: 0.0.40
codegen_flags: <defaults>
</compile_context>

<pallas_src>
import jax
import jax.numpy as jnp
from jax import lax
from jax.experimental import pallas as pl
from jax.experimental.pallas import tpu as pltpu


LANE = 128     # lane width   (last-dim alignment)
SUBLANE = 8    # f32 sublanes (second-to-last-dim alignment)


def _round_up(v, m):
    return ((v + m - 1) // m) * m


def _pad2(a, rows, cols):
    r, c = a.shape
    return jnp.pad(a, ((0, rows - r), (0, cols - c)))


def _vmem_limit_bytes():
    """Scoped-VMEM request, sized per generation with headroom."""
    try:
        cap = pltpu.get_tpu_info().vmem_capacity_bytes
    except Exception:
        cap = 64 << 20          # conservative: v7x per-TensorCore VMEM
    return min(int(cap) * 3 // 4, 96 << 20)


def _estimate_vmem(tile_m, tile_k, f, h_pad, c_pad, itemsize):
    weights = 2 * (f * h_pad + h_pad + h_pad * c_pad + c_pad) * 4   # resident params
    streams = 2 * (tile_m * tile_k + tile_k * f) * itemsize          # adj tile + x K-slab
    outputs = 2 * tile_m * c_pad * 4
    scratch = tile_m * h_pad * 4
    return weights + streams + outputs + scratch


def _pick_tiles(n, f, h_pad, c_pad, itemsize, budget):
    # Row tile: big enough to amortize per-step overhead; split mid-size graphs
    # into two row tiles so both TensorCores (v7x megacore) get work.
    if n <= 256:
        tm_candidates = (n,)
    elif n < 1024:
        tm_candidates = (_round_up((n + 1) // 2, SUBLANE), 256, 128)
    else:
        tm_candidates = (512, 256, 128)
    # K tile: prefer full-N (support slab computed once per row tile, no
    # masking); otherwise lane-aligned K tiles with in-kernel masking.
    tk_candidates = [tk for tk in (n, 1024, 512, 256, 128)
                     if tk <= n and (tk == n or tk % LANE == 0)]
    for tm in tm_candidates:
        for tk in tk_candidates:
            if _estimate_vmem(tm, tk, f, h_pad, c_pad, itemsize) <= budget:
                return tm, tk
    return tm_candidates[-1], tk_candidates[-1]


def _make_gcn_kernel(n_nodes, tile_k, mask_k, compute_dtype):
    def kernel(x_ref, adj_ref, w1_ref, b1_ref, w2_ref, b2_ref, o_ref, acc_ref):
        k = pl.program_id(1)

        @pl.when(k == 0)
        def _():
            acc_ref[...] = jnp.zeros_like(acc_ref)

        x_blk = x_ref[...]
        adj_blk = adj_ref[...]
        if mask_k:
            # Ragged last K tile: zero out-of-range x rows AND adj columns so
            # unspecified OOB data (possibly NaN) cannot poison the accumulator.
            base = k * tile_k
            row_ids = base + lax.broadcasted_iota(jnp.int32, (tile_k, 1), 0)
            col_ids = base + lax.broadcasted_iota(jnp.int32, (1, tile_k), 1)
            x_blk = jnp.where(row_ids < n_nodes, x_blk, 0)
            adj_blk = jnp.where(col_ids < n_nodes, adj_blk, 0)

        # support K-slab computed on the fly -> no HBM round trip for support.
        support = jnp.dot(x_blk, w1_ref[...], preferred_element_type=jnp.float32)
        acc_ref[...] += jnp.dot(
            adj_blk, support.astype(compute_dtype),
            preferred_element_type=jnp.float32)

        @pl.when(k == pl.num_programs(1) - 1)
        def _():
            h = jnp.maximum(acc_ref[...] + b1_ref[...], 0.0)
            out = jnp.dot(h.astype(compute_dtype), w2_ref[...],
                          preferred_element_type=jnp.float32) + b2_ref[...]
            o_ref[...] = out.astype(o_ref.dtype)

    return kernel


def gcn_forward(x, adj, w_gc, b_gc, w_lin, b_lin, *,
                tile_m=None, tile_k=None, use_bf16=False):
    """Fused GCN forward.  x:(N,F), adj:(N,N), W_gc:(F,H), W_lin:(H,C)."""
    x = jnp.asarray(x)
    adj = jnp.asarray(adj)
    N, F = x.shape
    H = w_gc.shape[1]
    C = w_lin.shape[1]

    h_pad = _round_up(H, LANE)
    c_pad = _round_up(C, LANE)

    in_dtype = jnp.bfloat16 if use_bf16 else jnp.float32
    xc = x.astype(in_dtype)
    adjc = adj.astype(in_dtype)
    # Only weights/biases are padded (tiny, one-off); x/adj/N are never padded.
    w1 = _pad2(jnp.asarray(w_gc).astype(in_dtype), F, h_pad)
    w2 = _pad2(jnp.asarray(w_lin).astype(in_dtype), h_pad, c_pad)
    b1 = _pad2(jnp.asarray(b_gc, jnp.float32).reshape(1, -1), 1, h_pad)
    b2 = _pad2(jnp.asarray(b_lin, jnp.float32).reshape(1, -1), 1, c_pad)

    vmem_limit = _vmem_limit_bytes()
    budget = int(vmem_limit * 0.7)
    itemsize = jnp.dtype(in_dtype).itemsize
    auto_tm, auto_tk = _pick_tiles(N, F, h_pad, c_pad, itemsize, budget)
    tm = min(tile_m, N) if tile_m is not None else auto_tm
    tk = min(tile_k, N) if tile_k is not None else auto_tk

    grid = (pl.cdiv(N, tm), pl.cdiv(N, tk))
    mask_k = (tk < N) and (N % tk != 0)

    kernel = _make_gcn_kernel(N, tk, mask_k, in_dtype)

    out = pl.pallas_call(
        kernel,
        out_shape=jax.ShapeDtypeStruct((N, c_pad), jnp.float32),
        grid=grid,
        in_specs=[
            pl.BlockSpec((tk, F), lambda i, k: (k, 0)),         # x K-slab
            pl.BlockSpec((tm, tk), lambda i, k: (i, k)),        # adj tile
            pl.BlockSpec((F, h_pad), lambda i, k: (0, 0)),      # W_gc (resident)
            pl.BlockSpec((1, h_pad), lambda i, k: (0, 0)),      # b_gc
            pl.BlockSpec((h_pad, c_pad), lambda i, k: (0, 0)),  # W_lin
            pl.BlockSpec((1, c_pad), lambda i, k: (0, 0)),      # b_lin
        ],
        out_specs=pl.BlockSpec((tm, c_pad), lambda i, k: (i, 0)),
        scratch_shapes=[pltpu.VMEM((tm, h_pad), jnp.float32)],
        compiler_params=pltpu.CompilerParams(
            dimension_semantics=("parallel", "arbitrary"),
            vmem_limit_bytes=vmem_limit,
        ),
    )(xc, adjc, w1, b1, w2, b2)

    return out[:, :C]


def gcn_reference(x, adj, w_gc, b_gc, w_lin, b_lin):
    support = x @ w_gc
    h = jnp.maximum(adj @ support + b_gc.reshape(1, -1), 0.0)
    return h @ w_lin + b_lin.reshape(1, -1)


def _make_inputs(key, N, F, H, C):
    kx, ka, k1, k2, k3, k4 = jax.random.split(key, 6)
    x = jax.random.normal(kx, (N, F), dtype=jnp.float32)
    # Symmetric, row-normalized adjacency (dense), deterministic.
    a = (jax.random.uniform(ka, (N, N)) > 0.7).astype(jnp.float32)
    a = jnp.maximum(a, a.T) + jnp.eye(N, dtype=jnp.float32)
    adj = a / jnp.sum(a, axis=1, keepdims=True)
    w_gc = jax.random.normal(k1, (F, H), dtype=jnp.float32) * 0.1
    b_gc = jax.random.normal(k2, (H,), dtype=jnp.float32) * 0.1
    w_lin = jax.random.normal(k3, (H, C), dtype=jnp.float32) * 0.1
    b_lin = jax.random.normal(k4, (C,), dtype=jnp.float32) * 0.1
    return x, adj, w_gc, b_gc, w_lin, b_lin


if __name__ == "__main__":
    key = jax.random.PRNGKey(0)
    k1, k2, k3 = jax.random.split(key, 3)

    # Test 1: module-consistent toy size (n_nodes=16, n_feat=32, n_hid=32,
    # n_classes=8) -> single row tile, full-K slab, one launch.
    args1 = _make_inputs(k1, N=16, F=32, H=32, C=8)
    out1 = jax.block_until_ready(gcn_forward(*args1))
    ref1 = gcn_reference(*args1)
    assert out1.shape == (16, 8)
    assert jnp.allclose(out1, ref1, atol=1e-4, rtol=1e-4)

    # Test 2: non-lane-aligned N (no padding of adj/x) -> full-K fused path.
    args2 = _make_inputs(k2, N=200, F=64, H=64, C=16)
    out2 = jax.block_until_ready(gcn_forward(*args2))
    ref2 = gcn_reference(*args2)
    assert out2.shape == (200, 16)
    assert jnp.allclose(out2, ref2, atol=5e-4, rtol=5e-4)

    # Test 3: forced K-splitting with ragged row and K tiles -> exercises the
    # K-reduction accumulator and the in-kernel OOB masking.
    args3 = _make_inputs(k3, N=600, F=64, H=32, C=10)
    out3 = jax.block_until_ready(gcn_forward(*args3, tile_m=256, tile_k=256))
    ref3 = gcn_reference(*args3)
    assert out3.shape == (600, 10)
    assert jnp.allclose(out3, ref3, atol=2e-3, rtol=2e-3)

    print("KERNEL_OK")
</pallas_src>

<mosaic_0001>
module attributes {stable_mosaic.version = 11 : i64} {
  func.func @kernel(%arg0: i32, %arg1: i32, %arg2: memref<16x32xf32, #tpu.memory_space<vmem>>, %arg3: memref<16x16xf32, #tpu.memory_space<vmem>>, %arg4: memref<32x128xf32, #tpu.memory_space<vmem>>, %arg5: memref<1x128xf32, #tpu.memory_space<vmem>>, %arg6: memref<128x128xf32, #tpu.memory_space<vmem>>, %arg7: memref<1x128xf32, #tpu.memory_space<vmem>>, %arg8: memref<16x128xf32, #tpu.memory_space<vmem>>, %arg9: memref<16x128xf32, #tpu.memory_space<vmem>>) attributes {dimension_semantics = [#tpu.dimension_semantics<parallel>, #tpu.dimension_semantics<arbitrary>], iteration_bounds = array<i64: 1, 1>, scalar_prefetch = 0 : i64, scratch_operands = 1 : i64, tpu.core_type = #tpu.core_type<tc>, window_params = [{transform_indices = @transform_0, window_bounds = array<i64: 16, 32>}, {transform_indices = @transform_1, window_bounds = array<i64: 16, 16>}, {pipeline_mode = #tpu.pipeline_mode<synchronous>, transform_indices = @transform_2, window_bounds = array<i64: 32, 128>}, {pipeline_mode = #tpu.pipeline_mode<synchronous>, transform_indices = @transform_3, window_bounds = array<i64: 1, 128>}, {pipeline_mode = #tpu.pipeline_mode<synchronous>, transform_indices = @transform_4, window_bounds = array<i64: 128, 128>}, {pipeline_mode = #tpu.pipeline_mode<synchronous>, transform_indices = @transform_5, window_bounds = array<i64: 1, 128>}, {transform_indices = @transform_6, window_bounds = array<i64: 16, 128>}]} {
    %c0_i32 = arith.constant 0 : i32
    %0 = arith.cmpi eq, %arg1, %c0_i32 : i32
    %1 = arith.extui %0 : i1 to i32
    %c0_i32_0 = arith.constant 0 : i32
    %2 = arith.cmpi ne, %1, %c0_i32_0 : i32
    scf.if %2 {
      %cst_13 = arith.constant 0.000000e+00 : f32
      %14 = vector.broadcast %cst_13 : f32 to vector<16x128xf32>
      %c0_14 = arith.constant 0 : index
      %c0_15 = arith.constant 0 : index
      %15 = vector.load %arg9[%c0_14, %c0_15] : memref<16x128xf32, #tpu.memory_space<vmem>>, vector<16x128xf32>
      tpu.vector_store %arg9[%c0_14, %c0_15], %14 {strides = array<i32>} : memref<16x128xf32, #tpu.memory_space<vmem>>, vector<16x128xf32>,
    } else {
    }
    %c0 = arith.constant 0 : index
    %c0_1 = arith.constant 0 : index
    %3 = vector.load %arg2[%c0, %c0_1] : memref<16x32xf32, #tpu.memory_space<vmem>>, vector<16x32xf32>
    %c0_2 = arith.constant 0 : index
    %c0_3 = arith.constant 0 : index
    %4 = vector.load %arg3[%c0_2, %c0_3] : memref<16x16xf32, #tpu.memory_space<vmem>>, vector<16x16xf32>
    %c0_4 = arith.constant 0 : index
    %c0_5 = arith.constant 0 : index
    %5 = vector.load %arg4[%c0_4, %c0_5] : memref<32x128xf32, #tpu.memory_space<vmem>>, vector<32x128xf32>
    %cst = arith.constant dense<0.000000e+00> : vector<16x128xf32>
    %6 = tpu.matmul %3, %5, %cst {dimension_numbers = #tpu.dot_dimension_numbers<[1], [0], [0], [1], [0, 0, 1, 1], [], []>} : vector<16x32xf32>, vector<32x128xf32>, vector<16x128xf32> -> vector<16x128xf32>
    %c0_6 = arith.constant 0 : index
    %c0_7 = arith.constant 0 : index
    %7 = vector.load %arg9[%c0_6, %c0_7] : memref<16x128xf32, #tpu.memory_space<vmem>>, vector<16x128xf32>
    %cst_8 = arith.constant dense<0.000000e+00> : vector<16x128xf32>
    %8 = tpu.matmul %4, %6, %cst_8 {dimension_numbers = #tpu.dot_dimension_numbers<[1], [0], [0], [1], [0, 0, 1, 1], [], []>} : vector<16x16xf32>, vector<16x128xf32>, vector<16x128xf32> -> vector<16x128xf32>
    %9 = arith.addf %7, %8 : vector<16x128xf32>
    %c0_9 = arith.constant 0 : index
    %c0_10 = arith.constant 0 : index
    %10 = vector.load %arg9[%c0_9, %c0_10] : memref<16x128xf32, #tpu.memory_space<vmem>>, vector<16x128xf32>
    tpu.vector_store %arg9[%c0_9, %c0_10], %9 {strides = array<i32>} : memref<16x128xf32, #tpu.memory_space<vmem>>, vector<16x128xf32>,
    %c0_i32_11 = arith.constant 0 : i32
    %11 = arith.cmpi eq, %arg1, %c0_i32_11 : i32
    %12 = arith.extui %11 : i1 to i32
    %c0_i32_12 = arith.constant 0 : i32
    %13 = arith.cmpi ne, %12, %c0_i32_12 : i32
    scf.if %13 {
      %c0_13 = arith.constant 0 : index
      %c0_14 = arith.constant 0 : index
      %14 = vector.load %arg9[%c0_13, %c0_14] : memref<16x128xf32, #tpu.memory_space<vmem>>, vector<16x128xf32>
      %c0_15 = arith.constant 0 : index
      %c0_16 = arith.constant 0 : index
      %15 = vector.load %arg5[%c0_15, %c0_16] : memref<1x128xf32, #tpu.memory_space<vmem>>, vector<1x128xf32>
      %16 = vector.broadcast %15 : vector<1x128xf32> to vector<16x128xf32>
      %17 = arith.addf %14, %16 : vector<16x128xf32>
      %cst_17 = arith.constant 0.000000e+00 : f32
      %18 = vector.broadcast %cst_17 : f32 to vector<16x128xf32>
      %19 = arith.maximumf %17, %18 : vector<16x128xf32>
      %c0_18 = arith.constant 0 : index
      %c0_19 = arith.constant 0 : index
      %20 = vector.load %arg6[%c0_18, %c0_19] : memref<128x128xf32, #tpu.memory_space<vmem>>, vector<128x128xf32>
      %cst_20 = arith.constant dense<0.000000e+00> : vector<16x128xf32>
      %21 = tpu.matmul %19, %20, %cst_20 {dimension_numbers = #tpu.dot_dimension_numbers<[1], [0], [0], [1], [0, 0, 1, 1], [], []>} : vector<16x128xf32>, vector<128x128xf32>, vector<16x128xf32> -> vector<16x128xf32>
      %c0_21 = arith.constant 0 : index
      %c0_22 = arith.constant 0 : index
      %22 = vector.load %arg7[%c0_21, %c0_22] : memref<1x128xf32, #tpu.memory_space<vmem>>, vector<1x128xf32>
      %23 = vector.broadcast %22 : vector<1x128xf32> to vector<16x128xf32>
      %24 = arith.addf %21, %23 : vector<16x128xf32>
      %c0_23 = arith.constant 0 : index
      %c0_24 = arith.constant 0 : index
      %25 = vector.load %arg8[%c0_23, %c0_24] : memref<16x128xf32, #tpu.memory_space<vmem>>, vector<16x128xf32>
      tpu.vector_store %arg8[%c0_23, %c0_24], %24 {strides = array<i32>} : memref<16x128xf32, #tpu.memory_space<vmem>>, vector<16x128xf32>,
    } else {
    }
    return
  }
  func.func @transform_0(%arg0: i32, %arg1: i32) -> (i32, i32) {
    %c0_i32 = arith.constant 0 : i32
    %c0_i32_0 = arith.constant 0 : i32
    return %arg1, %c0_i32 : i32, i32
  }
  func.func @transform_1(%arg0: i32, %arg1: i32) -> (i32, i32) {
    %c0_i32 = arith.constant 0 : i32
    return %arg0, %arg1 : i32, i32
  }
  func.func @transform_2(%arg0: i32, %arg1: i32) -> (i32, i32) {
    %c0_i32 = arith.constant 0 : i32
    %c0_i32_0 = arith.constant 0 : i32
    %c0_i32_1 = arith.constant 0 : i32
    return %c0_i32, %c0_i32_0 : i32, i32
  }
  func.func @transform_3(%arg0: i32, %arg1: i32) -> (i32, i32) {
    %c0_i32 = arith.constant 0 : i32
    %c0_i32_0 = arith.constant 0 : i32
    %c0_i32_1 = arith.constant 0 : i32
    return %c0_i32, %c0_i32_0 : i32, i32
  }
  func.func @transform_4(%arg0: i32, %arg1: i32) -> (i32, i32) {
    %c0_i32 = arith.constant 0 : i32
    %c0_i32_0 = arith.constant 0 : i32
    %c0_i32_1 = arith.constant 0 : i32
    return %c0_i32, %c0_i32_0 : i32, i32
  }
  func.func @transform_5(%arg0: i32, %arg1: i32) -> (i32, i32) {
    %c0_i32 = arith.constant 0 : i32
    %c0_i32_0 = arith.constant 0 : i32
    %c0_i32_1 = arith.constant 0 : i32
    return %c0_i32, %c0_i32_0 : i32, i32
  }
  func.func @transform_6(%arg0: i32, %arg1: i32) -> (i32, i32) {
    %c0_i32 = arith.constant 0 : i32
    %c0_i32_0 = arith.constant 0 : i32
    return %arg0, %c0_i32 : i32, i32
  }
}

</mosaic_0001>

<bundles_post_ra>
// kernel: tpu_custom_call.1
= control target key start
LH: loop header
LB: loop body
LE: loop exit
PB: predicated region body
PF: predicated region fallthrough
CT: control target
= control target key end

     0   :  { %11 = vsyncpa [#allocation4], 0  ;;  %s682_s0 = inlined_call_operand.hbm [shape: f32[16,32], index: 0, kind: input, shape index: {}]   ;;  %s683_s1 = inlined_call_operand.hbm [shape: f32[16,16], index: 1, kind: input, shape index: {}]   ;;  %s684_s2 = inlined_call_operand.hbm [shape: f32[32,128], index: 2, kind: input, shape index: {}]   ;;  %s685_s3 = inlined_call_operand.vmem [shape: f32[1,128], index: 3, kind: input, shape index: {}]   ;;  %s686_s4 = inlined_call_operand.hbm [shape: f32[128,128], index: 4, kind: input, shape index: {}]   ;;  %s687_s5 = inlined_call_operand.vmem [shape: f32[1,128], index: 5, kind: input, shape index: {}]   ;;  %s688_s6 = inlined_call_operand.hbm [shape: f32[16,128], index: 6, kind: output, shape index: {}]  }
   0x1   :  { %12 = vsyncpa [#allocation7], 0 }
   0x2   :  { %13 = vsyncpa [#allocation10], 0 }
   0x3   :  { %14 = vsyncpa [#allocation5], 0  ;;  %s600_s21 = smov [#allocation6]   ;;  %s601_s23 = smov [#allocation3]  }
   0x4   :  { %s32_s22 = sshll.u32 %s600_s21, 4  ;;  %s20_s24 = sshll.u32 %s601_s23, 4  ;;  %s33_s22 = int_to_ptr.vmem [resolvable:$true] %s32_s22  ;;  %s21_s24 = int_to_ptr.vmem [resolvable:$true] %s20_s24 }
   0x5   :  { %s500_s25 = scalar_lea.vmem %s33_s22, 256  ;;  %p505_p1 = scmp.lt.s32.totalorder %s33_s22, %s33_s22 }
   0x6   :  { %p501_p0 = scmp.ne.s32.totalorder %s33_s22, %s500_s25  ;;  %p506_p2 = scmp.lt.s32.totalorder %s500_s25, %s500_s25 }
   0x8   :  { %p507_p3 = por %p506_p2, %p505_p1 }
   0xa   :  { %p508_p4 = pnand %p507_p3, %p501_p0 }
   0xc   :  { %511 = shalt.err (!%p508_p4)
}
   0xd   :  { %s602_s26 = smov 128   ;;  %s603_s27 = smov 8  }
   0xe   :  { %38 = dma.hbm_to_vmem [thread:$0]  %s683_s1, 256, %s33_s22, [#allocation7], %s602_s26, %s602_s26, %s603_s27  }
   0xf   :  { %s520_s30 = scalar_lea.vmem %s21_s24, 256  ;;  %p525_p6 = scmp.lt.s32.totalorder %s21_s24, %s21_s24 }
  0x10   :  { %p521_p5 = scmp.ne.s32.totalorder %s21_s24, %s520_s30  ;;  %p526_p7 = scmp.lt.s32.totalorder %s520_s30, %s520_s30 }
  0x12   :  { %p527_p8 = por %p526_p7, %p525_p6 }
  0x14   :  { %p528_p9 = pnand %p527_p8, %p521_p5 }
  0x16   :  { %531 = shalt.err (!%p528_p9)
}
  0x17   :  { %26 = dma.hbm_to_vmem [thread:$0]  %s682_s0, 256, %s21_s24, [#allocation4], %s602_s26, %s602_s26, %s603_s27  }
  0x18   :  { %s604_s9 = smov [#allocation8]   ;;  %s605_s11 = smov [#allocation9]  }
  0x19   :  { %s44_s10 = sshll.u32 %s604_s9, 4  ;;  %s58_s12 = sshll.u32 %s605_s11, 4  ;;  %s45_s10 = int_to_ptr.vmem [resolvable:$true] %s44_s10  ;;  %s59_s12 = int_to_ptr.vmem [resolvable:$true] %s58_s12 }
  0x1a   :  { %s540_s1 = scalar_lea.vmem %s45_s10, 512  ;;  %p545_p11 = scmp.lt.s32.totalorder %s45_s10, %s45_s10 }
  0x1b   :  { %p541_p10 = scmp.ne.s32.totalorder %s45_s10, %s540_s1  ;;  %p546_p12 = scmp.lt.s32.totalorder %s540_s1, %s540_s1 }
  0x1d   :  { %p547_p13 = por %p546_p12, %p545_p11 }
  0x1f   :  { %p548_p0 = pnand %p547_p13, %p541_p10 }
  0x21   :  { %551 = shalt.err (!%p548_p0)
}
  0x22   :  { %50 = dma.hbm_to_vmem [thread:$0]  %s684_s2, 512, %s45_s10, [#allocation7], %s602_s26, %s602_s26, %s603_s27  }
  0x23   :  { %s560_s0 = scalar_lea.vmem %s59_s12, 2048  ;;  %p565_p2 = scmp.lt.s32.totalorder %s59_s12, %s59_s12 }
  0x24   :  { %p561_p1 = scmp.ne.s32.totalorder %s59_s12, %s560_s0  ;;  %p566_p3 = scmp.lt.s32.totalorder %s560_s0, %s560_s0 }
  0x26   :  { %p567_p4 = por %p566_p3, %p565_p2 }
  0x28   :  { %p568_p5 = pnand %p567_p4, %p561_p1 }
  0x2a   :  { %571 = shalt.err (!%p568_p5)
}
  0x2b   :  { %64 = dma.hbm_to_vmem [thread:$0]  %s686_s4, 2048, %s59_s12, [#allocation10], %s602_s26, %s602_s26, %s603_s27  }
  0x2c   :  { %592 = dma.done.wait [#allocation4], 256  }
  0x2d   :  { %593 = vsyncadd [#allocation4], 4294967040 }
  0x2e   :  { %594 = dma.done.wait [#allocation7], 768  }
  0x2f   :  { %595 = vsyncadd [#allocation7], 4294966528 }
  0x30   :  { %596 = dma.done.wait [#allocation10], 2048  }
  0x31   :  { %597 = vsyncadd [#allocation10], 4294965248  ;;  %vm93_vm0 = vcmask 261120   ;;  %v92_v0 = vld [vmem:[#allocation8 + $0x18] sm:$0xff]  ;;  %v91_v1 = vld [vmem:[#allocation8 + $0x10] sm:$0xff]  ;;  %vm177_vm1 = vcmask 130048  }
  0x32   :  { %432 = vmatprep.subr.mxu0 %v92_v0  ;;  %v85_v2 = vld [vmem:[#allocation3] sm:$0xff]  ;;  %v90_v3 = vld [vmem:[#allocation8 + $0x8] sm:$0xff]  ;;  %v87_v6 = vld [vmem:[#allocation6] sm:$0xff]  ;;  %s606_s19 = smov [#allocation11]  }
  0x33   :  { %433 = vmatpush3.msra.mxu0 %v92_v0  ;;  %440 = vmatprep.mubr.msk.f32.mxu0 %vm93_vm0, %v85_v2  ;;  %v89_v4 = vld [vmem:[#allocation8] sm:$0xff]  ;;  %v86_v5 = vld [vmem:[#allocation3 + $0x8] sm:$0xff]  ;;  %v294_v7 = vld [vmem:[#allocation9 + $0x78] sm:$0xff]  ;;  %s384_s20 = sshll.u32 %s606_s19, 4  ;;  %s385_s20 = int_to_ptr.vmem [resolvable:$true] %s384_s20 }
  0x34   :  { %434 = vmatprep.subr.mxu0 %v91_v1  ;;  %v293_v8 = vld [vmem:[#allocation9 + $0x70] sm:$0xff]  ;;  %450 = vmatprep.subr.mxu1 %v294_v7  ;;  %v292_v9 = vld [vmem:[#allocation9 + $0x68] sm:$0xff]  ;;  %v291_v10 = vld [vmem:[#allocation9 + $0x60] sm:$0xff]  ;;  %p577_p7 = scmp.lt.s32.totalorder %s385_s20, %s385_s20 }
  0x35   :  { %435 = vmatpush3.msra.mxu0 %v91_v1  ;;  %451 = vmatpush3.msra.mxu1 %v294_v7  ;;  %v290_v11 = vld [vmem:[#allocation9 + $0x58] sm:$0xff]  ;;  %v289_v12 = vld [vmem:[#allocation9 + $0x50] sm:$0xff]  ;;  %v288_v13 = vld [vmem:[#allocation9 + $0x48] sm:$0xff] }
  0x36   :  { %436 = vmatprep.subr.mxu0 %v90_v3  ;;  %452 = vmatprep.subr.mxu1 %v293_v8  ;;  %v287_v14 = vld [vmem:[#allocation9 + $0x40] sm:$0xff]  ;;  %v286_v15 = vld [vmem:[#allocation9 + $0x38] sm:$0xff]  ;;  %v285_v16 = vld [vmem:[#allocation9 + $0x30] sm:$0xff] }
  0x37   :  { %437 = vmatpush3.msra.mxu0 %v90_v3  ;;  %453 = vmatpush3.msra.mxu1 %v293_v8  ;;  %v284_v17 = vld [vmem:[#allocation9 + $0x28] sm:$0xff]  ;;  %v283_v18 = vld [vmem:[#allocation9 + $0x20] sm:$0xff]  ;;  %v88_v21 = vld [vmem:[#allocation6 + $0x8] sm:$0xff] }
  0x38   :  { %438 = vmatprep.subr.mxu0 %v89_v4  ;;  %454 = vmatprep.subr.mxu1 %v292_v9  ;;  %v282_v22 = vld [vmem:[#allocation9 + $0x18] sm:$0xff]  ;;  %v281_v23 = vld [vmem:[#allocation9 + $0x10] sm:$0xff]  ;;  %v280_v24 = vld [vmem:[#allocation9 + $0x8] sm:$0xff] }
  0x39   :  { %439 = vmatpush3.msra.mxu0 %v89_v4  ;;  %455 = vmatpush3.msra.mxu1 %v292_v9  ;;  %v279_v25 = vld [vmem:[#allocation9] sm:$0xff] }
  0x3a   :  { %441 = vmatmul.mubr.msk.f32.vlgmr.msra.gmra.mxu0 %vm93_vm0, %v86_v5  ;;  %456 = vmatprep.subr.mxu1 %v291_v10  ;;  %v402_v26 = vld [vmem:[%s685_s3] ss:$0 sm:$0xff]  ;;  %s572_s3 = scalar_lea.vmem %s385_s20, 256 }
  0x3b   :  { %447 = vmatprep.mubr.msk.f32.mxu0 %vm177_vm1, %v87_v6  ;;  %457 = vmatpush3.msra.mxu1 %v291_v10  ;;  %v403_v33 = vld [vmem:[%s687_s5] ss:$0 sm:$0xff]  ;;  %p573_p6 = scmp.ne.s32.totalorder %s385_s20, %s572_s3  ;;  %p578_p8 = scmp.lt.s32.totalorder %s572_s3, %s572_s3 }
  0x3c   :  { %458 = vmatprep.subr.mxu1 %v290_v11 }
  0x3d   :  { %459 = vmatpush3.msra.mxu1 %v290_v11  ;;  %p579_p9 = por %p578_p8, %p577_p7 }
  0x3e   :  { %460 = vmatprep.subr.mxu1 %v289_v12 }
  0x3f   :  { %461 = vmatpush3.msra.mxu1 %v289_v12  ;;  %p580_p10 = pnand %p579_p9, %p573_p6 }
  0x40   :  { %462 = vmatprep.subr.mxu1 %v288_v13 }
  0x41   :  { %463 = vmatpush3.msra.mxu1 %v288_v13 }
  0x42   :  { %464 = vmatprep.subr.mxu1 %v287_v14 }
  0x43   :  { %465 = vmatpush3.msra.mxu1 %v287_v14 }
  0x44   :  { %466 = vmatprep.subr.mxu1 %v286_v15 }
  0x45   :  { %467 = vmatpush3.msra.mxu1 %v286_v15 }
  0x46   :  { %468 = vmatprep.subr.mxu1 %v285_v16 }
  0x47   :  { %469 = vmatpush3.msra.mxu1 %v285_v16 }
  0x48   :  { %470 = vmatprep.subr.mxu1 %v284_v17 }
  0x49   :  { %471 = vmatpush3.msra.mxu1 %v284_v17 }
  0x4a   :  { %472 = vmatprep.subr.mxu1 %v283_v18 }
  0x4b   :  { %473 = vmatpush3.msra.mxu1 %v283_v18 }
  0x4c   :  { %474 = vmatprep.subr.mxu1 %v282_v22 }
  0x4d   :  { %475 = vmatpush3.msra.mxu1 %v282_v22 }
  0x4e   :  { %476 = vmatprep.subr.mxu1 %v281_v23 }
  0x4f   :  { %477 = vmatpush3.msra.mxu1 %v281_v23 }
  0x50   :  { %478 = vmatprep.subr.mxu1 %v280_v24 }
  0x51   :  { %479 = vmatpush3.msra.mxu1 %v280_v24 }
  0x52   :  { %480 = vmatprep.subr.mxu1 %v279_v25 }
  0x53   :  { %481 = vmatpush3.msra.mxu1 %v279_v25 }
  0xfa   :  { %v442_v19 = vpop.f32.mrf.mxu0 }
  0xfb   :  { %443 = vmatprep.subr.mxu0 %v442_v19 }
  0xfc   :  { %v166_v20 = vpop.f32.mrf.mxu0  ;;  %444 = vmatpush3.msra.mxu0 %v442_v19 }
  0xfd   :  { %445 = vmatprep.subr.mxu0 %v166_v20 }
  0xfe   :  { %446 = vmatpush3.msra.mxu0 %v166_v20 }
  0xff   :  { %448 = vmatmul.mubr.msk.f32.vlgmr.msra.gmra.mxu0 %vm177_vm1, %v88_v21 }
 0x1bf   :  { %v449_v27 = vpop.f32.mrf.mxu0 }
 0x1c0   :  { %v276_v28 = vadd.f32 %v449_v27, %v402_v26 }
 0x1c1   :  { %v250_v29 = vpop.f32.mrf.mxu0 }
 0x1c2   :  { %v275_v30 = vadd.f32 %v402_v26, %v250_v29  ;;  %v278_v32 = vmax.f32 %v276_v28, 0.0 }
 0x1c4   :  { %v277_v31 = vmax.f32 %v275_v30, 0.0 }
 0x1c6   :  { %482 = vmatprep.mubr.f32.mxu1 %v277_v31 }
 0x1c7   :  { %483 = vmatmul.mubr.f32.vlgmr.msra.gmra.mxu1 %v278_v32 }
 0x287   :  { %v484_v34 = vpop.f32.mrf.mxu1 }
 0x288   :  { %v374_v35 = vadd.f32 %v484_v34, %v403_v33 }
 0x289   :  { %v368_v36 = vpop.f32.mrf.mxu1 }
 0x28a   :  { %378 = vst [vmem:[#allocation11 + $0x8] sm:$0xff] %v374_v35  ;;  %v369_v37 = vadd.f32 %v403_v33, %v368_v36 }
 0x28c   :  { %377 = vst [vmem:[#allocation11] sm:$0xff] %v369_v37 }
 0x28d   :  { %583 = shalt.err (!%p580_p10)
}
 0x28e   :  { %390 = dma.vmem_to_hbm [thread:$0]  %s385_s20, 256, %s688_s6, [#allocation5], %s602_s26, %s602_s26, %s603_s27  }
 0x28f   :  { %598 = dma.done.wait [#allocation5], 256  }
 0x290   :  { %599 = vsyncadd [#allocation5], 4294967040 }
 0x291   :  { %394 = vsyncpa [#allocation4], 1 }
 0x292   :  { %395 = vsyncpa [#allocation7], 1 }
 0x293   :  { %396 = vsyncpa [#allocation10], 1 }
 0x294   :  { %397 = vsyncpa [#allocation5], 1 }

</bundles_post_ra>
